<compile_context>
chip_gen: v6e
topology: v6e:2x2x1
jax: 0.10.0
libtpu: 0.0.40
codegen_flags: <defaults>
</compile_context>

<pallas_src>
import functools
import math

import jax
import jax.numpy as jnp
import numpy as np
from jax import lax
from jax.experimental import pallas as pl
from jax.experimental.pallas import tpu as pltpu


def _cvu_kernel(x_ref, wt_ref, b_ref, out_ref, ssum_ref, acc_ref, *,
                m_keep, group_size, hw_total, needs_mask):
    """Streamed global-average-pool + channel-saliency epilogue.

    x_ref   : (BB, C, TILE_HW) native dtype  -- one spatial tile
    wt_ref  : (C, M)  f32
    b_ref   : (1, M)  f32
    out_ref : (BB, OUT) f32  -- expanded 0/1 channel mask
    ssum_ref: (BB, 1)   f32  -- per-sample sum of sigmoid saliencies (lasso)
    acc_ref : (BB, C)   f32 VMEM scratch -- running spatial sum
    """
    h = pl.program_id(1)
    n_h = pl.num_programs(1)
    BB, C, tile_hw = x_ref.shape
    M = wt_ref.shape[1]
    OUT = out_ref.shape[1]

    @pl.when(h == 0)
    def _():
        acc_ref[...] = jnp.zeros_like(acc_ref)

    # --- streamed spatial-sum accumulation (AdaptiveAvgPool2d(1)) ---
    xt = x_ref[...].astype(jnp.float32)            # cast per-tile in-kernel
    if needs_mask:                                 # static: only if HW % tile
        lane = lax.broadcasted_iota(jnp.int32, xt.shape, 2)
        xt = jnp.where(lane + h * tile_hw < hw_total, xt, 0.0)
    acc_ref[...] += jnp.sum(xt, axis=-1)

    # --- epilogue: runs once, on the last spatial tile only ---
    @pl.when(h == n_h - 1)
    def _():
        pooled = acc_ref[...] * (1.0 / hw_total)                       # (BB, C)

        # channel saliency predictor: Linear(C -> M), sigmoid
        logits = jnp.dot(pooled, wt_ref[...],
                         preferred_element_type=jnp.float32) + b_ref[...]
        s = jax.nn.sigmoid(logits)                                     # (BB, M)

        # lasso term: per-sample sum (batch-mean taken outside the kernel)
        ssum_ref[...] = jnp.sum(s, axis=-1, keepdims=True)

        # winner_take_all: keep the m_keep largest per row, ties -> lower idx
        # (matches torch.topk(-x) + scatter_(0) + (>0).int() up to tie order).
        s_j = s[:, :, None]                                            # (BB,M,1)
        s_i = s[:, None, :]                                            # (BB,1,M)
        idx_j = lax.broadcasted_iota(jnp.int32, (BB, M, M), 1)
        idx_i = lax.broadcasted_iota(jnp.int32, (BB, M, M), 2)
        before = jnp.logical_or(s_i > s_j,
                                jnp.logical_and(s_i == s_j, idx_i < idx_j))
        rank = jnp.sum(before.astype(jnp.int32), axis=-1)              # (BB, M)
        keep = (rank < m_keep).astype(jnp.float32)                     # 0/1

        # expand: out[:, c] = keep[:, c // group_size] via a tiny matmul
        # (avoids in-kernel reshapes of oddly shaped tiles).
        row = lax.broadcasted_iota(jnp.int32, (M, OUT), 0)
        col = lax.broadcasted_iota(jnp.int32, (M, OUT), 1)
        expand_mat = jnp.logical_and(col >= row * group_size,
                                     col < (row + 1) * group_size
                                     ).astype(jnp.float32)
        out_ref[...] = jnp.dot(keep, expand_mat,
                               preferred_element_type=jnp.float32)


def _pick_batch_block(B):
    """Batch block for the 'parallel' grid axis; keeps sublane rules happy."""
    if B > 8 and B % 8 == 0:
        return 8
    return B


def _pick_tile_hw(bb, C, HW, itemsize, target_bytes=4 << 20):
    """Largest multiple-of-128 spatial tile within ~4 MiB/buffer (v7x-safe)."""
    per_col = max(1, bb * C * itemsize)
    t = (target_bytes // per_col) // 128 * 128
    if t <= 0:
        t = 128
    if t >= HW:
        return HW
    return int(t)


def channel_vector_unit_pallas(x, w, b, *, out_channels, group_size, sparsity,
                               tile_hw=None):
    """Core compute of ChannelVectorUnit.forward for the target stage.

    x: (B, C_in, H, W) in its native dtype (f32 or bf16), w: (M, C_in),
    b: (M,) with M = out_channels // group_size.
    Returns (channel_mask (B, out_channels) float32, lasso_increment scalar).
    """
    B, C, H, W = x.shape
    M = out_channels // group_size
    HW = H * W
    assert w.shape == (M, C) and b.shape == (M,)
    assert sparsity < 1.0 and M > 1
    # TODO(synk): the sparsity >= 1.0 (identity) and M == 1 (all-ones) branches
    # of winner_take_all are trivial host-side cases and are not lowered here.

    k = math.ceil((1.0 - sparsity) * M)
    m_keep = M - k

    bb = _pick_batch_block(B)
    itemsize = jnp.dtype(x.dtype).itemsize
    if tile_hw is None:
        tile_hw = _pick_tile_hw(bb, C, HW, itemsize)
    tile_hw = min(int(tile_hw), HW)
    needs_mask = (HW % tile_hw) != 0
    grid = (B // bb, pl.cdiv(HW, tile_hw))

    x3 = x.reshape(B, C, HW)                 # NO dtype cast: stream native dtype
    wt = w.T.astype(jnp.float32)             # (C, M)
    b2 = b.reshape(1, M).astype(jnp.float32)

    tile_bytes = bb * C * tile_hw * itemsize
    vmem_limit = int(min(64 << 20, max(8 << 20, 2 * tile_bytes + (4 << 20))))

    kernel = functools.partial(_cvu_kernel, m_keep=m_keep,
                               group_size=group_size, hw_total=HW,
                               needs_mask=needs_mask)
    mask, ssum = pl.pallas_call(
        kernel,
        out_shape=(jax.ShapeDtypeStruct((B, out_channels), jnp.float32),
                   jax.ShapeDtypeStruct((B, 1), jnp.float32)),
        grid=grid,
        in_specs=[pl.BlockSpec((bb, C, tile_hw), lambda bi, hi: (bi, 0, hi)),
                  pl.BlockSpec((C, M), lambda bi, hi: (0, 0)),
                  pl.BlockSpec((1, M), lambda bi, hi: (0, 0))],
        out_specs=(pl.BlockSpec((bb, out_channels), lambda bi, hi: (bi, 0)),
                   pl.BlockSpec((bb, 1), lambda bi, hi: (bi, 0))),
        scratch_shapes=[pltpu.VMEM((bb, C), jnp.float32)],
        compiler_params=pltpu.CompilerParams(
            dimension_semantics=("parallel", "arbitrary"),
            vmem_limit_bytes=vmem_limit),
    )(x3, wt, b2)

    lasso = jnp.mean(ssum)                   # batch-mean of per-row sums
    return mask, lasso


def channel_vector_unit_forward(x, meta, w, b, *, out_channels, group_size,
                                sparsity, target_stage, tile_hw=None):
    """Mirrors ChannelVectorUnit.forward (full_feature=True, pooling='ave')."""
    if meta['stage_id'] not in target_stage:
        return jnp.ones((x.shape[0], out_channels), jnp.float32), meta
    mask, lasso = channel_vector_unit_pallas(
        x, w, b, out_channels=out_channels, group_size=group_size,
        sparsity=sparsity, tile_hw=tile_hw)
    meta['lasso_sum'] = meta['lasso_sum'] + lasso
    meta['channel_prediction'][(meta['stage_id'], meta['block_id'])] = mask
    return mask, meta


def _reference(x, w, b, *, group_size, sparsity):
    """Pure-JAX reference of the same forward path."""
    B, C, H, W = x.shape
    pooled = jnp.mean(x.reshape(B, C, -1).astype(jnp.float32), axis=-1)
    s = jax.nn.sigmoid(pooled @ w.T + b)
    lasso = jnp.mean(jnp.sum(s, axis=-1))
    M = s.shape[-1]
    k = math.ceil((1.0 - sparsity) * M)
    rank = jnp.argsort(jnp.argsort(-s, axis=-1), axis=-1)   # descending rank
    keep = (rank < (M - k)).astype(jnp.float32)
    out = jnp.repeat(keep, group_size, axis=-1)
    return out, lasso


if __name__ == "__main__":
    # Small config; HW = 324 forces 3 spatial tiles of 128 with a masked tail,
    # exercising the gridded/streamed accumulation path.
    B, C_in, H, W = 2, 32, 18, 18
    out_channels = 16
    group_size = 2
    sparsity = 0.5          # channel_budget
    target_stage = (1,)
    M = out_channels // group_size

    key = jax.random.PRNGKey(0)
    kx, kw = jax.random.split(key)
    x = jax.random.normal(kx, (B, C_in, H, W), dtype=jnp.float32)

    # Deterministic params matching the module init:
    # kaiming_normal_(fan_out, relu): std = sqrt(2 / fan_out), fan_out = M
    w = jax.random.normal(kw, (M, C_in), dtype=jnp.float32) * np.sqrt(2.0 / M)
    b = jnp.ones((M,), dtype=jnp.float32)   # nn.init.constant_(bias, 1.0)

    meta = {'stage_id': 1, 'block_id': 0, 'lasso_sum': jnp.float32(0.0),
            'channel_prediction': {}, 'saliency_mask': None, 'masks': []}

    mask, meta = channel_vector_unit_forward(
        x, meta, w, b, out_channels=out_channels, group_size=group_size,
        sparsity=sparsity, target_stage=target_stage, tile_hw=128)
    mask = jax.block_until_ready(mask)
    lasso = jax.block_until_ready(meta['lasso_sum'])

    ref_mask, ref_lasso = _reference(x, w, b, group_size=group_size,
                                     sparsity=sparsity)
    np.testing.assert_array_equal(np.asarray(mask), np.asarray(ref_mask))
    np.testing.assert_allclose(float(lasso), float(ref_lasso),
                               rtol=1e-4, atol=1e-4)
    assert mask.shape == (B, out_channels) and mask.dtype == jnp.float32

    print("KERNEL_OK")
</pallas_src>

<mosaic_0001>
module attributes {stable_mosaic.version = 11 : i64} {
  func.func @_cvu_kernel(%arg0: i32, %arg1: i32, %arg2: memref<2x32x128xf32, #tpu.memory_space<vmem>>, %arg3: memref<32x8xf32, #tpu.memory_space<vmem>>, %arg4: memref<1x8xf32, #tpu.memory_space<vmem>>, %arg5: memref<2x16xf32, #tpu.memory_space<vmem>>, %arg6: memref<2x1xf32, #tpu.memory_space<vmem>>, %arg7: memref<2x32xf32, #tpu.memory_space<vmem>>) attributes {dimension_semantics = [#tpu.dimension_semantics<parallel>, #tpu.dimension_semantics<arbitrary>], iteration_bounds = array<i64: 1, 3>, scalar_prefetch = 0 : i64, scratch_operands = 1 : i64, tpu.core_type = #tpu.core_type<tc>, window_params = [{transform_indices = @transform_0, window_bounds = array<i64: 2, 32, 128>}, {pipeline_mode = #tpu.pipeline_mode<synchronous>, transform_indices = @transform_1, window_bounds = array<i64: 32, 8>}, {pipeline_mode = #tpu.pipeline_mode<synchronous>, transform_indices = @transform_2, window_bounds = array<i64: 1, 8>}, {transform_indices = @transform_3, window_bounds = array<i64: 2, 16>}, {transform_indices = @transform_4, window_bounds = array<i64: 2, 1>}]} {
    %c0_i32 = arith.constant 0 : i32
    %0 = arith.cmpi eq, %arg1, %c0_i32 : i32
    %1 = arith.extui %0 : i1 to i32
    %c0_i32_0 = arith.constant 0 : i32
    %2 = arith.cmpi ne, %1, %c0_i32_0 : i32
    scf.if %2 {
      %cst_9 = arith.constant 0.000000e+00 : f32
      %19 = vector.broadcast %cst_9 : f32 to vector<2x32xf32>
      %c0_10 = arith.constant 0 : index
      %c0_11 = arith.constant 0 : index
      %20 = vector.load %arg7[%c0_10, %c0_11] : memref<2x32xf32, #tpu.memory_space<vmem>>, vector<2x32xf32>
      tpu.vector_store %arg7[%c0_10, %c0_11], %19 {strides = array<i32>} : memref<2x32xf32, #tpu.memory_space<vmem>>, vector<2x32xf32>,
    } else {
    }
    %c0 = arith.constant 0 : index
    %c0_1 = arith.constant 0 : index
    %c0_2 = arith.constant 0 : index
    %3 = vector.load %arg2[%c0, %c0_1, %c0_2] : memref<2x32x128xf32, #tpu.memory_space<vmem>>, vector<2x32x128xf32>
    %4 = tpu.iota {dimensions = array<i32: 2>} : vector<2x32x128xi32>
    %c128_i32 = arith.constant 128 : i32
    %5 = arith.muli %arg1, %c128_i32 : i32
    %6 = vector.broadcast %5 : i32 to vector<2x32x128xi32>
    %7 = arith.addi %4, %6 : vector<2x32x128xi32>
    %c324_i32 = arith.constant 324 : i32
    %8 = vector.broadcast %c324_i32 : i32 to vector<2x32x128xi32>
    %9 = arith.cmpi slt, %7, %8 : vector<2x32x128xi32>
    %cst = arith.constant 0.000000e+00 : f32
    %10 = vector.broadcast %cst : f32 to vector<2x32x128xf32>
    %11 = arith.select %9, %3, %10 : vector<2x32x128xi1>, vector<2x32x128xf32>
    %c0_3 = arith.constant 0 : index
    %c0_4 = arith.constant 0 : index
    %12 = vector.load %arg7[%c0_3, %c0_4] : memref<2x32xf32, #tpu.memory_space<vmem>>, vector<2x32xf32>
    %cst_5 = arith.constant dense<0.000000e+00> : vector<2x32xf32>
    %13 = vector.multi_reduction <add>, %11, %cst_5 [2] : vector<2x32x128xf32> to vector<2x32xf32>
    %14 = arith.addf %12, %13 : vector<2x32xf32>
    %c0_6 = arith.constant 0 : index
    %c0_7 = arith.constant 0 : index
    %15 = vector.load %arg7[%c0_6, %c0_7] : memref<2x32xf32, #tpu.memory_space<vmem>>, vector<2x32xf32>
    tpu.vector_store %arg7[%c0_6, %c0_7], %14 {strides = array<i32>} : memref<2x32xf32, #tpu.memory_space<vmem>>, vector<2x32xf32>,
    %c2_i32 = arith.constant 2 : i32
    %16 = arith.cmpi eq, %arg1, %c2_i32 : i32
    %17 = arith.extui %16 : i1 to i32
    %c0_i32_8 = arith.constant 0 : i32
    %18 = arith.cmpi ne, %17, %c0_i32_8 : i32
    scf.if %18 {
      %c0_9 = arith.constant 0 : index
      %c0_10 = arith.constant 0 : index
      %19 = vector.load %arg7[%c0_9, %c0_10] : memref<2x32xf32, #tpu.memory_space<vmem>>, vector<2x32xf32>
      %cst_11 = arith.constant 0.00308641978 : f32
      %20 = vector.broadcast %cst_11 : f32 to vector<2x32xf32>
      %21 = arith.mulf %19, %20 : vector<2x32xf32>
      %c0_12 = arith.constant 0 : index
      %c0_13 = arith.constant 0 : index
      %22 = vector.load %arg3[%c0_12, %c0_13] : memref<32x8xf32, #tpu.memory_space<vmem>>, vector<32x8xf32>
      %cst_14 = arith.constant dense<0.000000e+00> : vector<2x8xf32>
      %23 = tpu.matmul %21, %22, %cst_14 {dimension_numbers = #tpu.dot_dimension_numbers<[1], [0], [0], [1], [0, 0, 1, 1], [], []>} : vector<2x32xf32>, vector<32x8xf32>, vector<2x8xf32> -> vector<2x8xf32>
      %c0_15 = arith.constant 0 : index
      %c0_16 = arith.constant 0 : index
      %24 = vector.load %arg4[%c0_15, %c0_16] : memref<1x8xf32, #tpu.memory_space<vmem>>, vector<1x8xf32>
      %25 = vector.broadcast %24 : vector<1x8xf32> to vector<2x8xf32>
      %26 = arith.addf %23, %25 : vector<2x8xf32>
      %27 = arith.negf %26 : vector<2x8xf32>
      %28 = math.exp %27 : vector<2x8xf32>
      %cst_17 = arith.constant 1.000000e+00 : f32
      %29 = vector.broadcast %cst_17 : f32 to vector<2x8xf32>
      %30 = arith.addf %29, %28 : vector<2x8xf32>
      %31 = arith.divf %29, %30 : vector<2x8xf32>
      %cst_18 = arith.constant dense<0.000000e+00> : vector<2xf32>
      %32 = vector.multi_reduction <add>, %31, %cst_18 [1] : vector<2x8xf32> to vector<2xf32>
      %33 = vector.shape_cast %32 : vector<2xf32> to vector<2x1xf32>
      %c0_19 = arith.constant 0 : index
      %c0_20 = arith.constant 0 : index
      %34 = vector.load %arg6[%c0_19, %c0_20] : memref<2x1xf32, #tpu.memory_space<vmem>>, vector<2x1xf32>
      tpu.vector_store %arg6[%c0_19, %c0_20], %33 {strides = array<i32>} : memref<2x1xf32, #tpu.memory_space<vmem>>, vector<2x1xf32>,
      %35 = vector.shape_cast %31 : vector<2x8xf32> to vector<2x8x1xf32>
      %36 = vector.shape_cast %31 : vector<2x8xf32> to vector<2x1x8xf32>
      %37 = tpu.iota {dimensions = array<i32: 1>} : vector<2x8x8xi32>
      %38 = tpu.iota {dimensions = array<i32: 2>} : vector<2x8x8xi32>
      %39 = vector.broadcast %36 : vector<2x1x8xf32> to vector<2x8x8xf32>
      %40 = vector.broadcast %35 : vector<2x8x1xf32> to vector<2x8x8xf32>
      %41 = arith.cmpf ogt, %39, %40 : vector<2x8x8xf32>
      %42 = vector.broadcast %36 : vector<2x1x8xf32> to vector<2x8x8xf32>
      %43 = vector.broadcast %35 : vector<2x8x1xf32> to vector<2x8x8xf32>
      %44 = arith.cmpf oeq, %42, %43 : vector<2x8x8xf32>
      %45 = arith.cmpi slt, %38, %37 : vector<2x8x8xi32>
      %46 = arith.andi %44, %45 : vector<2x8x8xi1>
      %47 = arith.ori %41, %46 : vector<2x8x8xi1>
      %48 = arith.extui %47 : vector<2x8x8xi1> to vector<2x8x8xi32>
      %cst_21 = arith.constant dense<0> : vector<2x8xi32>
      %49 = vector.multi_reduction <add>, %48, %cst_21 [2] : vector<2x8x8xi32> to vector<2x8xi32>
      %c4_i32 = arith.constant 4 : i32
      %50 = vector.broadcast %c4_i32 : i32 to vector<2x8xi32>
      %51 = arith.cmpi slt, %49, %50 : vector<2x8xi32>
      %52 = arith.extui %51 : vector<2x8xi1> to vector<2x8xi32>
      %53 = arith.sitofp %52 : vector<2x8xi32> to vector<2x8xf32>
      %54 = tpu.iota {dimensions = array<i32: 0>} : vector<8x16xi32>
      %55 = tpu.iota {dimensions = array<i32: 1>} : vector<8x16xi32>
      %c2_i32_22 = arith.constant 2 : i32
      %56 = vector.broadcast %c2_i32_22 : i32 to vector<8x16xi32>
      %57 = arith.muli %54, %56 : vector<8x16xi32>
      %58 = arith.cmpi sge, %55, %57 : vector<8x16xi32>
      %c1_i32 = arith.constant 1 : i32
      %59 = vector.broadcast %c1_i32 : i32 to vector<8x16xi32>
      %60 = arith.addi %54, %59 : vector<8x16xi32>
      %c2_i32_23 = arith.constant 2 : i32
      %61 = vector.broadcast %c2_i32_23 : i32 to vector<8x16xi32>
      %62 = arith.muli %60, %61 : vector<8x16xi32>
      %63 = arith.cmpi slt, %55, %62 : vector<8x16xi32>
      %64 = arith.andi %58, %63 : vector<8x16xi1>
      %65 = arith.extui %64 : vector<8x16xi1> to vector<8x16xi32>
      %66 = arith.sitofp %65 : vector<8x16xi32> to vector<8x16xf32>
      %cst_24 = arith.constant dense<0.000000e+00> : vector<2x16xf32>
      %67 = tpu.matmul %53, %66, %cst_24 {dimension_numbers = #tpu.dot_dimension_numbers<[1], [0], [0], [1], [0, 0, 1, 1], [], []>} : vector<2x8xf32>, vector<8x16xf32>, vector<2x16xf32> -> vector<2x16xf32>
      %c0_25 = arith.constant 0 : index
      %c0_26 = arith.constant 0 : index
      %68 = vector.load %arg5[%c0_25, %c0_26] : memref<2x16xf32, #tpu.memory_space<vmem>>, vector<2x16xf32>
      tpu.vector_store %arg5[%c0_25, %c0_26], %67 {strides = array<i32>} : memref<2x16xf32, #tpu.memory_space<vmem>>, vector<2x16xf32>,
    } else {
    }
    return
  }
  func.func @transform_0(%arg0: i32, %arg1: i32) -> (i32, i32, i32) {
    %c0_i32 = arith.constant 0 : i32
    %c0_i32_0 = arith.constant 0 : i32
    return %arg0, %c0_i32, %arg1 : i32, i32, i32
  }
  func.func @transform_1(%arg0: i32, %arg1: i32) -> (i32, i32) {
    %c0_i32 = arith.constant 0 : i32
    %c0_i32_0 = arith.constant 0 : i32
    %c0_i32_1 = arith.constant 0 : i32
    return %c0_i32, %c0_i32_0 : i32, i32
  }
  func.func @transform_2(%arg0: i32, %arg1: i32) -> (i32, i32) {
    %c0_i32 = arith.constant 0 : i32
    %c0_i32_0 = arith.constant 0 : i32
    %c0_i32_1 = arith.constant 0 : i32
    return %c0_i32, %c0_i32_0 : i32, i32
  }
  func.func @transform_3(%arg0: i32, %arg1: i32) -> (i32, i32) {
    %c0_i32 = arith.constant 0 : i32
    %c0_i32_0 = arith.constant 0 : i32
    return %arg0, %c0_i32 : i32, i32
  }
  func.func @transform_4(%arg0: i32, %arg1: i32) -> (i32, i32) {
    %c0_i32 = arith.constant 0 : i32
    %c0_i32_0 = arith.constant 0 : i32
    return %arg0, %c0_i32 : i32, i32
  }
}

</mosaic_0001>

<bundles_post_ra>
// kernel: tpu_custom_call.1
= control target key start
LH: loop header
LB: loop body
LE: loop exit
PB: predicated region body
PF: predicated region fallthrough
CT: control target
= control target key end

     0   :  { %10 = vsyncpa [#allocation4], 0  ;;  %s1187_s0 = inlined_call_operand.hbm [shape: f32[2,32,324], index: 0, kind: input, shape index: {}]   ;;  %s1188_s1 = inlined_call_operand.vmem [shape: f32[32,8], index: 1, kind: input, shape index: {}]   ;;  %s1189_s2 = inlined_call_operand.vmem [shape: f32[1,8], index: 2, kind: input, shape index: {}]   ;;  %s1190_s3 = inlined_call_operand.hbm [shape: f32[2,16], index: 3, kind: output, shape index: {0}]   ;;  %s1191_s4 = inlined_call_operand.vmem [shape: f32[2,1], index: 4, kind: output, shape index: {1}]  }
   0x1   :  { %12 = vsyncpa [#allocation4 + $0x1], 0 }
   0x2   :  { %13 = vsyncpa [#allocation5], 0  ;;  %s994_s15 = smov 0   ;;  %s996_s16 = smov 0  }
   0x3   :  { %s998_s17 = smov 0   ;;  %s1000_s18 = smov 0  }
   0x4   :  { %s1002_s19 = smov 0   ;;  %s1004_s20 = smov 0  }
   0x5 LB: > { %s729_s21 = sadd.s32 4294967295, %s956_s20   ;;  %s28_s22 = sadd.s32 1, %s952_s19  ;;  %s956_s20 = sphi %s1004_s20, %s19_s20   ;;  %s952_s19 = sphi %s1002_s19, %s1200_s19   ;;  %s948_s18 = sphi %s1000_s18, %s1199_s18   ;;  %s944_s17 = sphi %s998_s17, %s1198_s17   ;;  %s940_s16 = sphi %s996_s16, %s1197_s16   ;;  %s936_s15 = sphi %s994_s15, %s1196_s15  }
   0x6   : > { %p29_p0 = scmp.ge.s32.totalorder %s28_s22, 3  ;;  %s40_s23 = sadd.s32 1, %s944_s17 }
   0x7   : > { %p47_p1 = scmp.ne.s32.totalorder %s944_s17, %s940_s16  ;;  %p48_p2 = scmp.eq.s32.totalorder %s956_s20, 0 }
   0x8   : > { %s1202_s22 = smov (%p29_p0, %s28_s22), 0  ;;  %p53_p4 = scmp.ne.s32.totalorder %s940_s16, %s936_s15 }
   0x9   : > { %p1030_p3 = por %p48_p2, %p47_p1  ;;  %s36_s25 = ssub.s32 %s952_s19, %s1202_s22 }
   0xa   : > { %p54_p5 = scmp.eq.s32.totalorder %s729_s21, 0  ;;  %p38_p6 = scmp.eq.s32.totalorder %s36_s25, 0 }
   0xb   : > { %p785_p8 = scmp.lt.s32.totalorder %s956_s20, 3  ;;  %s177_s28 = sand.u32 1, %s944_s17  }
   0xc   : > { %p1039_p7 = por %p54_p5, %p53_p4  ;;  %s733_s29 = sshll.u32 %s952_s19, 7 }
   0xd   : > { %s1045_s27 = scalar_select %p38_p6, %s944_s17, %s40_s23  }
   0xe   : > { %s732_s30 = sshll.u32 %s177_s28, 6  ;;  %s189_s7 = scalar_lea.hbm %s1187_s0, %s733_s29 }
   0xf   : > { %s181_s8 = scalar_lea.vmem [#allocation3], %s732_s30  ;;  %p1054_p9 = pnand %p785_p8, %p1030_p3 }
  0x10   : > { %s190_s9 = sshll.u32 %s181_s8, 4  ;;  %p734_p10 = scmp.ge.s32.totalorder %s956_s20, 1  ;;  %s191_s9 = int_to_ptr.vmem [resolvable:$true] %s190_s9 }
  0x11   : > { %s178_s11 = scalar_lea.sflag [#allocation4], %s177_s28  ;;  %p852_p11 = pneg %p1054_p9 }
  0x12   : > { %s863_s12 = scalar_lea.vmem %s191_s9, 1024  ;;  %s958_s13 = smov [#allocation3]  }
  0x13   : > { %p864_p12 = scmp.ne.s32.totalorder %s191_s9, %s863_s12  ;;  %s868_s14 = sshll.u32 %s958_s13, 4  ;;  %s869_s14 = int_to_ptr.vmem [resolvable:$false] %s868_s14 }
  0x14   : > { %s870_s15 = scalar_lea.vmem %s869_s14, 2048  ;;  %p871_p1 = scmp.lt.s32.totalorder %s191_s9, %s869_s14 }
  0x15   : > { %p866_p13 = pnand %p864_p12, %p852_p11  ;;  %p872_p2 = scmp.lt.s32.totalorder %s870_s15, %s863_s12 }
  0x17   : > { %p867_p0 = pneg %p866_p13  ;;  %p873_p3 = por %p872_p2, %p871_p1 }
  0x19   : > { %p874_p4 = pnand %p873_p3, %p867_p0 }
  0x1b   : > { %877 = shalt.err (!%p874_p4)
}
  0x1c   : > { %s959_s23 = smov 384   ;;  %s960_s24 = smov 128  }
  0x1d   : > { %s961_s25 = smov 8   ;;  %p198_p5 = scmp.lt.s32.totalorder %s956_s20, 4 }
  0x1e   : > { %784 = dma.hbm_to_vmem [thread:$0]  (!%p1054_p9), %s189_s7, 1024, %s191_s9, %s178_s11, %s959_s23, %s960_s24, %s961_s25  }
  0x1f   : > { %p199_p6 = pnand %p734_p10, %p198_p5 }
  0x20   : > { %s204_s28 = sand.u32 (!%p199_p6), 1, %s940_s16  }
  0x21   : > { %202 = sbr.rel (%p199_p6) target bundleno = 940 (0x3ac), region = 32  ;;  %s735_s29 = sshll.u32 (!%p199_p6), %s204_s28, 6 }
  0x22   : > { %s205_s30 = scalar_lea.sflag (!%p199_p6), [#allocation4], %s204_s28  ;;  %s1067_s5 = scalar_lea.vmem (!%p199_p6), [#allocation3], %s735_s29 }
  0x26   : > { %927 = dma.done.wait (%p1039_p7), %s205_s30, 1024  }
  0x27   : > { %929 = vsyncadd (%p1039_p7), %s205_s30, 4294966272  ;;  %p736_p8 = scmp.ne.s32.totalorder %s948_s18, 0 }
  0x29   : > { %240 = sbr.rel (%p736_p8) target bundleno = 48 (0x30), region = 40 }
  0x2e   : > { %vm241_vm0 = vcmask 254976   ;;  %v962_v0 = vmov 0.0  }
  0x2f   : > { %242 = vst.msk [vmem:[#allocation2] sm:$0x3] %vm241_vm0, %v962_v0 }
  0x30 PF: > { %v251_v1 = vlaneseq  ;;  %s737_s6 = sshll.u32 %s948_s18, 7  ;;  %v247_v5 = vld [vmem:[%s1067_s5 + $0x20] sm:$0xff]  ;;  %v248_v9 = vld [vmem:[%s1067_s5 + $0x28] sm:$0xff]  ;;  %v249_v15 = vld [vmem:[%s1067_s5 + $0x30] sm:$0xff]  ;;  %vm299_vm2 = vcmask 130112   ;;  %vm306_vm3 = vcmask 195712  }
  0x31   : > { %v254_v2 = vstv %s737_s6  ;;  %v243_v7 = vld [vmem:[%s1067_s5] sm:$0xff]  ;;  %v244_v10 = vld [vmem:[%s1067_s5 + $0x8] sm:$0xff]  ;;  %v245_v16 = vld [vmem:[%s1067_s5 + $0x10] sm:$0xff]  ;;  %vm313_vm4 = vcmask 261312   ;;  %vm334_vm5 = vcmask 1041409   ;;  %vm338_vm6 = vcmask 254976  }
  0x32   : > { %v1075_v3 = vand.u32 127, %v251_v1  ;;  %v1077_v4 = vshrl.u32 %v251_v1, 7  ;;  %v250_v19 = vld [vmem:[%s1067_s5 + $0x38] sm:$0xff]  ;;  %p738_p7 = scmp.ne.s32.totalorder %s948_s18, 2 }
  0x33   : > { %v246_v20 = vld [vmem:[%s1067_s5 + $0x18] sm:$0xff] }
  0x34   : > { %v255_v6 = vadd.s32 %v254_v2, %v1075_v3  ;;  %v1084_v8 = vsub.s32 %v1075_v3, %v1077_v4  ;;  %v294_v23 = vadd.s32 4294967288, %v1075_v3  ;;  %v301_v25 = vadd.s32 4294967280, %v1075_v3 }
  0x35   : > { %v308_v27 = vadd.s32 4294967272, %v1075_v3 }
  0x36   : > { %vm256_vm1 = vcmp.lt.s32.totalorder %v255_v6, 324  ;;  %v297_v24 = vsub.s32 %v294_v23, %v1077_v4  ;;  %v304_v26 = vsub.s32 %v301_v25, %v1077_v4  ;;  %v265_v49 = vld [vmem:[#allocation2] sm:$0x3] }
  0x37   : > { %v261_v11 = vsel %vm256_vm1, %v247_v5, 0.0  ;;  %v257_v12 = vsel %vm256_vm1, %v243_v7, 0.0  ;;  %v262_v13 = vsel %vm256_vm1, %v248_v9, 0.0  ;;  %v258_v14 = vsel %vm256_vm1, %v244_v10, 0.0 }
  0x38   : > { %274 = vadd.xlane.f32.xlu1 %v261_v11  ;;  %266 = vadd.xlane.f32.xlu0 %v257_v12  ;;  %v263_v17 = vsel %vm256_vm1, %v249_v15, 0.0  ;;  %v259_v18 = vsel %vm256_vm1, %v245_v16, 0.0  ;;  %v264_v21 = vsel %vm256_vm1, %v250_v19, 0.0  ;;  %v260_v22 = vsel %vm256_vm1, %v246_v20, 0.0 }
  0x39   : > { %v311_v28 = vsub.s32 %v308_v27, %v1077_v4 }
  0x3c   : > { %276 = vadd.xlane.f32.xlu1 %v262_v13  ;;  %268 = vadd.xlane.f32.xlu0 %v258_v14 }
  0x40   : > { %278 = vadd.xlane.f32.xlu1 %v263_v17  ;;  %270 = vadd.xlane.f32.xlu0 %v259_v18 }
  0x44   : > { %280 = vadd.xlane.f32.xlu1 %v264_v21  ;;  %272 = vadd.xlane.f32.xlu0 %v260_v22 }
  0xc1   : > { %v275_v29 = vpop.xlane.xlu1 %274  ;;  %v267_v30 = vpop.xlane.xlu0 %266 }
  0xc2   : > { %v318_v33 = vrot.slane %v275_v29, %v1084_v8  ;;  %v293_v34 = vrot.slane %v267_v30, %v1084_v8 }
  0xc5   : > { %v277_v31 = vpop.xlane.xlu1 %276  ;;  %v269_v32 = vpop.xlane.xlu0 %268 }
  0xc6   : > { %v322_v35 = vrot.slane %v277_v31, %v297_v24  ;;  %v298_v36 = vrot.slane %v269_v32, %v297_v24 }
  0xc8   : > { %v323_v37 = vsel %vm299_vm2, %v322_v35, %v318_v33  ;;  %v300_v38 = vsel %vm299_vm2, %v298_v36, %v293_v34 }
  0xc9   : > { %v279_v39 = vpop.xlane.xlu1 %278  ;;  %v271_v40 = vpop.xlane.xlu0 %270 }
  0xca   : > { %v327_v41 = vrot.slane %v279_v39, %v304_v26  ;;  %v305_v42 = vrot.slane %v271_v40, %v304_v26 }
  0xcc   : > { %v328_v43 = vsel %vm306_vm3, %v327_v41, %v323_v37  ;;  %v307_v44 = vsel %vm306_vm3, %v305_v42, %v300_v38 }
  0xcd   : > { %v281_v45 = vpop.xlane.xlu1 %280  ;;  %v273_v46 = vpop.xlane.xlu0 %272 }
  0xce   : > { %v332_v47 = vrot.slane %v281_v45, %v311_v28  ;;  %v312_v48 = vrot.slane %v273_v46, %v311_v28 }
  0xd0   : > { %v333_v50 = vsel %vm313_vm4, %v332_v47, %v328_v43  ;;  %v314_v51 = vsel %vm313_vm4, %v312_v48, %v307_v44  ;;  %343 = sbr.rel (%p738_p7) target bundleno = 925 (0x39d), region = 44 }
  0xd1   : > { %v335_v52 = vsel %vm334_vm5, %v333_v50, %v314_v51 }
  0xd2   : > { %v337_v53 = vadd.f32 %v335_v52, %v265_v49 }
  0xd4   : > { %339 = vst.msk [vmem:[#allocation2] sm:$0x3] %vm338_vm6, %v337_v53 }
  0xd5   : > { %v349_v54 = vld [vmem:[%s1188_s1 + $0x18] sm:$0xff]  ;;  %v963_v55 = vmov 0.0   ;;  %v348_v56 = vld [vmem:[%s1188_s1 + $0x10] sm:$0xff]  ;;  %vm964_vm7 = vmmov 0   ;;  %v347_v58 = vld [vmem:[%s1188_s1 + $0x8] sm:$0xff]  ;;  %vm357_vm8 = vcmask 261120   ;;  %vm496_vm9 = vcmp.lt.s32.totalorder %v1075_v3, %v1077_v4 }
  0xd6   : > { %759 = vmatprep.subr.mxu0 %v963_v55  ;;  %767 = vmatprep.mubr.msk.f32.mxu0 %vm964_vm7, %v963_v55  ;;  %v346_v59 = vld [vmem:[%s1188_s1] sm:$0xff]  ;;  %v965_v6 = vmov 1966171168   ;;  %v445_v10 = vsub.s32 0, %v1077_v4  ;;  %v452_v14 = vsub.s32 1, %v1077_v4  ;;  %vm503_vm13 = vcmask 64512  }
  0xd7   : > { %760 = vmatpush3.msra.mxu0 %v349_v54  ;;  %770 = vmatprep.subr.mxu1 %v963_v55  ;;  %v739_v61 = vld [vmem:[%s1189_s2] ss:$0 sm:$0xff]  ;;  %v459_v7 = vunpack.c.l.s4 %v965_v6  ;;  %v966_v24 = vmov 0   ;;  %vm437_vm3 = vcmask 58368   ;;  %v538_v38 = vadd.s32 1, %v1077_v4 }
  0xd8   : > { %761 = vmatprep.subr.mxu0 %v963_v55  ;;  %772 = vmatprep.mubr.msk.f32.mxu1 %vm964_vm7, %v963_v55  ;;  %v536_v39 = vmul.u32 2, %v1077_v4  ;;  %v967_v41 = vmov 1.0  }
  0xd9   : > { %762 = vmatpush3.msra.mxu0 %v348_v56  ;;  %v460_v9 = vunpack.c.0.s8 %v459_v7  ;;  %v539_v40 = vmul.u32 2, %v538_v38 }
  0xda   : > { %763 = vmatprep.subr.mxu0 %v963_v55  ;;  %vm537_vm4 = vcmp.ge.s32.totalorder %v1075_v3, %v536_v39 }
  0xdb   : > { %v344_v57 = vld [vmem:[#allocation2] sm:$0x3]  ;;  %764 = vmatpush3.msra.mxu0 %v347_v58  ;;  %v463_v11 = vsub.s32 %v460_v9, %v1077_v4  ;;  %vm540_vm6 = vcmp.lt.s32.totalorder %v1075_v3, %v539_v40 }
  0xdc   : > { %v345_v60 = vmul.f32 0.0030864198, %v344_v57  ;;  %765 = vmatprep.subr.mxu0 %v963_v55  ;;  %vm541_vm7 = vmand %vm537_vm4, %vm540_vm6 }
  0xdd   : > { %766 = vmatpush3.msra.mxu0 %v346_v59  ;;  %771 = vmatpush3.msk.msra.mxu1 %vm541_vm7, %v967_v41 }
  0xde   : > { %768 = vmatmul.mubr.msk.f32.vlgmr.msra.gmra.mxu0 %vm357_vm8, %v345_v60 }
 0x19e   : > { %v427_v62 = vpop.f32.mrf.mxu0 }
 0x19f   : > { %v428_v63 = vadd.f32 %v739_v61, %v427_v62 }
 0x1a0   : > { %v769_v0 = vpop.f32.mrf.mxu0 }
 0x1a1   : > { %v741_v1 = vmul.f32 -1.442695, %v428_v63 }
 0x1a3   : > { %846 = vpow2.f32 %v741_v1 }
 0x1b0   : > { %v847_v2 = vpop.eup %846 }
 0x1b1   : > { %v434_v5 = vadd.f32 1.0, %v847_v2 }
 0x1b3   : > { %848 = vrcp.f32 %v434_v5 }
 0x1c0   : > { %v849_v12 = vpop.eup %848 }
 0x1c1   : > { %v446_v13 = vrot.slane %v849_v12, %v445_v10  ;;  %v464_v15 = vrot.slane %v849_v12, %v463_v11  ;;  %v453_v18 = vrot.slane %v849_v12, %v452_v14  ;;  %v438_v37 = vsel %vm437_vm3, %v849_v12, 0.0 }
 0x1c3   : > { %448 = vbcast.lane.b32.xlu0 %v446_v13, 256  ;;  %v472_v16 = vrot.slane %v464_v15, %v463_v11  ;;  %v465_v17 = vcombine.high %v464_v15, %v464_v15 }
 0x1c5   : > { %v485_v19 = vrot.slane %v472_v16, %v445_v10  ;;  %v479_v20 = vrot.slane %v465_v17, %v463_v11 }
 0x1c7   : > { %455 = vbcast.lane.b32.xlu0 %v453_v18, 256  ;;  %v489_v21 = vrot.slane %v479_v20, %v445_v10 }
 0x235   : > { %v449_v22 = vpop.permute.xlu0 %448 }
 0x236   : > { %vm492_vm10 = vcmp.gt.f32.partialorder %v485_v19, %v449_v22  ;;  %vm494_vm11 = vcmp.eq.f32.partialorder %v485_v19, %v449_v22 }
 0x237   : > { %vm497_vm12 = vmand %vm494_vm11, %vm496_vm9  ;;  %vm627_vm11 = vcmask 123904  }
 0x238   : > { %vm499_vm14 = vmor %vm492_vm10, %vm497_vm12 }
 0x239   : > { %v456_v23 = vpop.permute.xlu0 %455  ;;  %v501_v25 = vsel %vm499_vm14, 1, %v966_v24 }
 0x23a   : > { %vm493_vm15 = vcmp.gt.f32.partialorder %v489_v21, %v456_v23  ;;  %vm495_vm0 = vcmp.eq.f32.partialorder %v489_v21, %v456_v23  ;;  %v504_v26 = vsel %vm503_vm13, %v501_v25, 0 }
 0x23b   : > { %vm498_vm1 = vmand %vm495_vm0, %vm496_vm9  ;;  %v506_v27 = vshrl.u32 %v504_v26, 16  ;;  %v505_v28 = vand.u32 65535, %v504_v26  ;;  %vm441_vm9 = vcmask 1024  }
 0x23c   : > { %vm500_vm2 = vmor %vm493_vm15, %vm498_vm1 }
 0x23d   : > { %v508_v29 = vcvt.s32.f32 %v506_v27  ;;  %v507_v30 = vcvt.s32.f32 %v505_v28  ;;  %v502_v31 = vsel %vm500_vm2, 1, %v966_v24 }
 0x23e   : > { %v517_v32 = vsel %vm503_vm13, %v502_v31, 0 }
 0x23f   : > { %511 = vadd.xlane.f32.xlu1 %v508_v29  ;;  %509 = vadd.xlane.f32.xlu0 %v507_v30  ;;  %v519_v33 = vshrl.u32 %v517_v32, 16  ;;  %v518_v35 = vand.u32 65535, %v517_v32 }
 0x241   : > { %v521_v34 = vcvt.s32.f32 %v519_v33  ;;  %v520_v36 = vcvt.s32.f32 %v518_v35 }
 0x243   : > { %524 = vadd.xlane.f32.xlu1 %v521_v34 }
 0x247   : > { %522 = vadd.xlane.f32.xlu1 %v520_v36 }
 0x24b   : > { %439 = vadd.xlane.f32.xlu1 %v438_v37 }
 0x2c8   : > { %v512_v42 = vpop.xlane.xlu1 %511  ;;  %v510_v43 = vpop.xlane.xlu0 %509 }
 0x2c9   : > { %v514_v44 = vcvt.f32.s32 %v512_v42  ;;  %v513_v46 = vcvt.f32.s32 %v510_v43 }
 0x2cb   : > { %v515_v45 = vshll.u32 %v514_v44, 16 }
 0x2cc   : > { %v525_v47 = vpop.xlane.xlu1 %524 }
 0x2cd   : > { %v516_v48 = vadd.s32 %v515_v45, %v513_v46  ;;  %v527_v49 = vcvt.f32.s32 %v525_v47 }
 0x2cf   : > { %vm530_vm8 = vcmp.lt.s32.totalorder %v516_v48, 4  ;;  %v528_v51 = vshll.u32 %v527_v49, 16 }
 0x2d0   : > { %v523_v50 = vpop.xlane.xlu1 %522  ;;  %v742_v53 = vsel %vm530_vm8, 1.0, %v963_v55 }
 0x2d1   : > { %v526_v4 = vcvt.f32.s32 %v523_v50  ;;  %v549_v56 = vrot.slane %v742_v53, %v1084_v8 }
 0x2d3   : > { %v529_v52 = vadd.s32 %v528_v51, %v526_v4 }
 0x2d4   : > { %v440_v3 = vpop.xlane.xlu1 %439 }
 0x2d5   : > { %vm531_vm10 = vcmp.lt.s32.totalorder %v529_v52, 4  ;;  %442 = vst.msk [vmem:[%s1191_s4] sm:$0x3] %vm441_vm9, %v440_v3 }
 0x2d6   : > { %v743_v54 = vsel %vm531_vm10, 1.0, %v963_v55 }
 0x2d7   : > { %v553_v57 = vrot.slane %v743_v54, %v1084_v8 }
 0x2d9   : > { %v554_v58 = vsel %vm334_vm5, %v553_v57, %v549_v56 }
 0x2da   : > { %773 = vmatmul.mubr.msk.f32.vlgmr.msra.gmra.mxu1 %vm503_vm13, %v554_v58 }
 0x39a   : > { %v623_v59 = vpop.f32.mrf.mxu1 }
 0x39b   : > { %628 = vst.msk [vmem:[#allocation6] sm:$0x3] %vm627_vm11, %v623_v59 }
 0x39c   : > { %v774_v60 = vpop.f32.mrf.mxu1 }
 0x39d PF: > { %p1154_p9 = scmp.eq.s32.totalorder %s729_s21, 2  ;;  %s968_s25 = smov [#allocation6]  }
 0x39e   : > { %s642_s28 = sshll.u32 %s968_s25, 4  ;;  %s643_s28 = int_to_ptr.vmem [resolvable:$true] %s642_s28 }
 0x39f   : > { %s878_s29 = scalar_lea.vmem %s643_s28, 32  ;;  %p885_p13 = scmp.lt.s32.totalorder %s643_s28, %s643_s28 }
 0x3a0   : > { %p879_p10 = scmp.ne.s32.totalorder %s643_s28, %s878_s29  ;;  %p886_p0 = scmp.lt.s32.totalorder %s878_s29, %s878_s29 }
 0x3a2   : > { %p880_p11 = pnand %p879_p10, %p1154_p9  ;;  %p887_p1 = por %p886_p0, %p885_p13 }
 0x3a4   : > { %p881_p12 = pneg %p880_p11 }
 0x3a6   : > { %p888_p2 = pnand %p887_p1, %p881_p12 }
 0x3a8   : > { %891 = shalt.err (!%p888_p2)
}
 0x3a9   : > { %778 = dma.vmem_to_hbm [thread:$0]  (%p1154_p9), %s643_s28, 32, %s1190_s3, [#allocation5]  }
 0x3aa   : > { %931 = dma.done.wait (%p1154_p9), [#allocation5], 32  }
 0x3ab   : > { %933 = vsyncadd (%p1154_p9), [#allocation5], 4294967264 }
 0x3ac PF: > { %s19_s20 = sadd.s32 1, %s956_s20   ;;  %s1196_s15 = smov %s940_s16 }
 0x3ad   : > { %p16_p3 = scmp.ge.s32.totalorder %s19_s20, 5   ;;  %s1197_s16 = smov %s944_s17 }
 0x3ae   : > { %s1198_s17 = smov %s1045_s27  ;;  %s1199_s18 = smov %s952_s19 }
 0x3af   : > { %s1200_s19 = smov %s1202_s22  ;;  %18 = sbr.rel (!%p16_p3) target bundleno = 5 (0x5), region = 90 }
 0x3b4   :  { %665 = vsyncpa [#allocation4], 1 }
 0x3b5   :  { %667 = vsyncpa [#allocation4 + $0x1], 1 }
 0x3b6   :  { %668 = vsyncpa [#allocation5], 1 }
 0x3b7   :  { %670 = vsyncpa [#allocation5 + $0x1], 1 }

</bundles_post_ra>
